<compile_context>
chip_gen: v7x
topology: tpu7x:2x2x1
jax: 0.10.0
libtpu: 0.0.40
codegen_flags: <defaults>
</compile_context>

<pallas_src>
import functools

import jax
import jax.numpy as jnp
from jax.experimental import pallas as pl
from jax.experimental.pallas import tpu as pltpu


def _round_up(x, m):
    return ((x + m - 1) // m) * m


def _outconv_kernel(x_ref, w_ref, b_ref, o_ref):
    # x_ref: (1, C_in, TS), w_ref: (C_out, C_in), b_ref: (C_out, 1),
    # o_ref: (1, C_out, TS)
    x = x_ref[0].astype(jnp.float32)                      # (C_in, TS)
    w = w_ref[...].astype(jnp.float32)                    # (C_out, C_in)
    acc = jnp.dot(w, x, preferred_element_type=jnp.float32)   # (C_out, TS)
    acc = acc + b_ref[...].astype(jnp.float32)            # broadcast over lanes
    o_ref[0] = jax.nn.sigmoid(acc).astype(o_ref.dtype)


@functools.partial(jax.jit, static_argnames=("tile_s",))
def outconv_forward(x_nchw, weight, bias, *, tile_s=2048):
    """1x1 conv + sigmoid.

    x_nchw: (N, C_in, H, W)
    weight: (C_out, C_in, 1, 1)   (PyTorch Conv2d layout)
    bias:   (C_out,)
    returns (N, C_out, H, W)
    """
    N, C_in, H, W = x_nchw.shape
    C_out = weight.shape[0]
    S = H * W

    # Lane-dense tile: multiple of 128, no larger than the padded spatial size.
    tile_s = max(128, min(tile_s, _round_up(S, 128)))
    tile_s = _round_up(tile_s, 128)
    S_pad = _round_up(S, tile_s)

    # Free reshape (contiguous): NCHW -> (N, C_in, S); pad spatial if needed.
    x_flat = x_nchw.reshape(N, C_in, S)
    if S_pad != S:
        x_flat = jnp.pad(x_flat, ((0, 0), (0, 0), (0, S_pad - S)))

    w_mat = weight.reshape(C_out, C_in)      # (C_out, C_in) — LHS of the matmul
    b_mat = bias.reshape(C_out, 1)           # (C_out, 1)    — broadcast over lanes

    grid = (N, S_pad // tile_s)

    out_flat = pl.pallas_call(
        _outconv_kernel,
        out_shape=jax.ShapeDtypeStruct((N, C_out, S_pad), x_nchw.dtype),
        grid=grid,
        in_specs=[
            pl.BlockSpec((1, C_in, tile_s), lambda n, s: (n, 0, s)),
            pl.BlockSpec((C_out, C_in), lambda n, s: (0, 0)),   # resident weight
            pl.BlockSpec((C_out, 1), lambda n, s: (0, 0)),      # resident bias
        ],
        out_specs=pl.BlockSpec((1, C_out, tile_s), lambda n, s: (n, 0, s)),
        compiler_params=pltpu.CompilerParams(
            dimension_semantics=("parallel", "parallel"),
            # Safe on v5e/v6e/v7x (>= all scoped defaults, < v7x 64 MiB physical);
            # blocks here are KiB-scale so this leaves ample pipeline headroom.
            vmem_limit_bytes=32 * 1024 * 1024,
        ),
    )(x_flat, w_mat, b_mat)

    # (N, C_out, S_pad) -> slice padding -> (N, C_out, H, W); both ops are cheap.
    return out_flat[:, :, :S].reshape(N, C_out, H, W)


if __name__ == "__main__":
    # Small shapes: batch=2, in_channel=4, out_channel=2, spatial=16x16.
    N, C_in, C_out, H, W = 2, 4, 2, 16, 16

    key = jax.random.PRNGKey(0)
    kx, kw, kb = jax.random.split(key, 3)

    x = jax.random.normal(kx, (N, C_in, H, W), dtype=jnp.float32)
    # Deterministic, PyTorch-like uniform init for Conv2d(k=1): bound = 1/sqrt(C_in*1*1)
    bound = 1.0 / jnp.sqrt(jnp.float32(C_in))
    weight = jax.random.uniform(kw, (C_out, C_in, 1, 1), jnp.float32, -bound, bound)
    bias = jax.random.uniform(kb, (C_out,), jnp.float32, -bound, bound)

    out = outconv_forward(x, weight, bias)
    jax.block_until_ready(out)

    # Reference check in plain JAX (1x1 conv == channel matmul + bias, then sigmoid).
    ref = jax.nn.sigmoid(
        jnp.einsum("nchw,oc->nohw", x, weight.reshape(C_out, C_in))
        + bias[None, :, None, None]
    )
    assert out.shape == (N, C_out, H, W)
    assert jnp.allclose(out, ref, atol=1e-5, rtol=1e-5)

    print("KERNEL_OK")
</pallas_src>

<mosaic_0001>
module attributes {stable_mosaic.version = 11 : i64} {
  func.func @_outconv_kernel(%arg0: i32, %arg1: i32, %arg2: memref<1x4x256xf32, #tpu.memory_space<vmem>>, %arg3: memref<2x4xf32, #tpu.memory_space<vmem>>, %arg4: memref<2x1xf32, #tpu.memory_space<vmem>>, %arg5: memref<1x2x256xf32, #tpu.memory_space<vmem>>) attributes {dimension_semantics = [#tpu.dimension_semantics<parallel>, #tpu.dimension_semantics<parallel>], iteration_bounds = array<i64: 2, 1>, scalar_prefetch = 0 : i64, scratch_operands = 0 : i64, tpu.core_type = #tpu.core_type<tc>, window_params = [{transform_indices = @transform_0, window_bounds = array<i64: 1, 4, 256>}, {pipeline_mode = #tpu.pipeline_mode<synchronous>, transform_indices = @transform_1, window_bounds = array<i64: 2, 4>}, {pipeline_mode = #tpu.pipeline_mode<synchronous>, transform_indices = @transform_2, window_bounds = array<i64: 2, 1>}, {transform_indices = @transform_3, window_bounds = array<i64: 1, 2, 256>}]} {
    %c0 = arith.constant 0 : index
    %c0_0 = arith.constant 0 : index
    %c0_1 = arith.constant 0 : index
    %0 = vector.load %arg2[%c0, %c0_0, %c0_1] : memref<1x4x256xf32, #tpu.memory_space<vmem>>, vector<1x4x256xf32>
    %1 = vector.shape_cast %0 : vector<1x4x256xf32> to vector<4x256xf32>
    %c0_2 = arith.constant 0 : index
    %c0_3 = arith.constant 0 : index
    %2 = vector.load %arg3[%c0_2, %c0_3] : memref<2x4xf32, #tpu.memory_space<vmem>>, vector<2x4xf32>
    %cst = arith.constant dense<0.000000e+00> : vector<2x256xf32>
    %3 = tpu.matmul %2, %1, %cst {dimension_numbers = #tpu.dot_dimension_numbers<[1], [0], [0], [1], [0, 0, 1, 1], [], []>} : vector<2x4xf32>, vector<4x256xf32>, vector<2x256xf32> -> vector<2x256xf32>
    %c0_4 = arith.constant 0 : index
    %c0_5 = arith.constant 0 : index
    %4 = vector.load %arg4[%c0_4, %c0_5] : memref<2x1xf32, #tpu.memory_space<vmem>>, vector<2x1xf32>
    %5 = vector.broadcast %4 : vector<2x1xf32> to vector<2x256xf32>
    %6 = arith.addf %3, %5 : vector<2x256xf32>
    %7 = arith.negf %6 : vector<2x256xf32>
    %8 = math.exp %7 : vector<2x256xf32>
    %cst_6 = arith.constant 1.000000e+00 : f32
    %9 = vector.broadcast %cst_6 : f32 to vector<2x256xf32>
    %10 = arith.addf %9, %8 : vector<2x256xf32>
    %11 = arith.divf %9, %10 : vector<2x256xf32>
    %c0_7 = arith.constant 0 : index
    %c0_8 = arith.constant 0 : index
    %c0_9 = arith.constant 0 : index
    %12 = vector.load %arg5[%c0_7, %c0_8, %c0_9] : memref<1x2x256xf32, #tpu.memory_space<vmem>>, vector<1x2x256xf32>
    %13 = vector.shape_cast %12 : vector<1x2x256xf32> to vector<2x256xf32>
    %14 = vector.shape_cast %11 : vector<2x256xf32> to vector<1x2x256xf32>
    tpu.vector_store %arg5[%c0_7, %c0_8, %c0_9], %14 {strides = array<i32>} : memref<1x2x256xf32, #tpu.memory_space<vmem>>, vector<1x2x256xf32>,
    return
  }
  func.func @transform_0(%arg0: i32, %arg1: i32) -> (i32, i32, i32) {
    %c0_i32 = arith.constant 0 : i32
    %c0_i32_0 = arith.constant 0 : i32
    return %arg0, %c0_i32, %arg1 : i32, i32, i32
  }
  func.func @transform_1(%arg0: i32, %arg1: i32) -> (i32, i32) {
    %c0_i32 = arith.constant 0 : i32
    %c0_i32_0 = arith.constant 0 : i32
    %c0_i32_1 = arith.constant 0 : i32
    return %c0_i32, %c0_i32_0 : i32, i32
  }
  func.func @transform_2(%arg0: i32, %arg1: i32) -> (i32, i32) {
    %c0_i32 = arith.constant 0 : i32
    %c0_i32_0 = arith.constant 0 : i32
    %c0_i32_1 = arith.constant 0 : i32
    return %c0_i32, %c0_i32_0 : i32, i32
  }
  func.func @transform_3(%arg0: i32, %arg1: i32) -> (i32, i32, i32) {
    %c0_i32 = arith.constant 0 : i32
    %c0_i32_0 = arith.constant 0 : i32
    return %arg0, %c0_i32, %arg1 : i32, i32, i32
  }
}

</mosaic_0001>

<bundles_post_ra>
// kernel: outconv_forward.1
= control target key start
LH: loop header
LB: loop body
LE: loop exit
PB: predicated region body
PF: predicated region fallthrough
CT: control target
= control target key end

     0   :  { %s512_s12 = smov 0   ;;  %s514_s13 = smov 0   ;;  %s555_s0 = inlined_call_operand.vmem [shape: f32[2,4,256], index: 0, kind: input, shape index: {}]   ;;  %s556_s1 = inlined_call_operand.vmem [shape: f32[2,4], index: 1, kind: input, shape index: {}]   ;;  %s557_s2 = inlined_call_operand.vmem [shape: f32[2,1], index: 2, kind: input, shape index: {}]   ;;  %s558_s3 = inlined_call_operand.vmem [shape: f32[2,2,256], index: 3, kind: output, shape index: {}]  }
   0x1   :  { %s516_s14 = smov 0  }
   0x2 LB: > { %s25_s15 = sadd.s32 1, %s484_s13  ;;  %p415_p0 = scmp.ge.s32.totalorder %s488_s14, 1  ;;  %s488_s14 = sphi %s516_s14, %s13_s14   ;;  %s484_s13 = sphi %s514_s13, %s560_s13   ;;  %s480_s12 = sphi %s512_s12, %s559_s12  }
   0x3   : > { %p27_p1 = scmp.ge.s32.totalorder %s25_s15, 2  ;;  %p158_p2 = scmp.lt.s32.totalorder %s488_s14, 3 }
   0x5   : > { %s562_s15 = smov (%p27_p1, %s25_s15), 0  ;;  %p159_p3 = pnand %p415_p0, %p158_p2 }
   0x6   : > { %p191_p4 = scmp.lt.s32.totalorder (!%p159_p3), %s480_s12, 1  ;;  %v490_v0 = vmov (!%p159_p3), 0.0   ;;  %v212_v1 = vld [vmem:[%s557_s2] sm:$0x3] (!%p159_p3)  ;;  %v491_v2 = vmov (!%p159_p3), 0   ;;  %vm224_vm0 = vcmask (!%p159_p3), 1043456  }
   0x7   : > { %162 = sbr.rel (%p159_p3) target bundleno = 266 (0x10a), region = 32  ;;  %293 = vmatprep.mubr.f32.mxu0 (!%p159_p3), %v490_v0  ;;  %456 = vset.pattern.permute.xlu0 (!%p159_p3), %v491_v2  ;;  %v211_v5 = vld [vmem:[%s556_s1] sm:$0x3] (!%p159_p3)  ;;  %vm220_vm1 = vcmask (!%p159_p3), 31744  }
   0x8   : > { %215 = vperm.xlu0 (!%p159_p3), %456, %v212_v1  }
   0xe   : > { %s564_s12 = smov (!%p191_p4, %s480_s12), 1 }
   0xf   : > { %s428_s18 = sshll.u32 %s564_s12, 3  ;;  %s429_s24 = sshll.u32 %s564_s12, 2 }
  0x10   : > { %s198_s21 = scalar_lea.vmem %s555_s0, %s428_s18  ;;  %s208_s27 = scalar_lea.vmem %s558_s3, %s429_s24 }
  0x11   : > { %v210_v3 = vld [vmem:[%s198_s21] sm:$0xff] }
  0x12   : > { %v219_v4 = vcombine.high %v210_v3, %v210_v3 }
  0x14   : > { %420 = vmatprep.subr.msk.mxu0 %vm224_vm0, %v219_v4 }
  0x15   : > { %421 = vmatpush1.msk.msra.mxu0 %vm224_vm0, %v210_v3 }
  0x16   : > { %422 = vmatmul.mubr.msk.f32.vlgmr.msra.gmra.mrb[0].mxu0 %vm220_vm1, %v211_v5 }
  0x87   : > { %v216_v6 = vpop.permute.xlu0 %215 }
  0xe9   : > { %v295_v7 = vpop.f32.mrb[0].mxu0 }
  0xea   : > { %v296_v8 = vadd.f32 %v295_v7, %v216_v6  ;;  %v297_v9 = vpop.f32.mrb[1].mxu0 }
  0xeb   : > { %v298_v10 = vadd.f32 %v297_v9, %v216_v6 }
  0xec   : > { %v423_v11 = vmul.f32 -1.442695, %v296_v8 }
  0xed   : > { %v424_v12 = vmul.f32 -1.442695, %v298_v10 }
  0xee   : > { %458 = vpow2.f32 %v423_v11 }
  0xef   : > { %460 = vpow2.f32 %v424_v12 }
  0xf8   : > { %v459_v13 = vpop.eup %458 }
  0xf9   : > { %v461_v14 = vpop.eup %460  ;;  %v306_v15 = vadd.f32 1.0, %v459_v13 }
  0xfa   : > { %v307_v16 = vadd.f32 1.0, %v461_v14 }
  0xfb   : > { %462 = vrcp.f32 %v306_v15 }
  0xfc   : > { %464 = vrcp.f32 %v307_v16 }
 0x105   : > { %v463_v17 = vpop.eup %462 }
 0x106   : > { %v465_v18 = vpop.eup %464 }
 0x107   : > { %v314_v19 = vcombine.low %v463_v17, %v465_v18 }
 0x109   : > { %425 = vst.sshfl [vmem:[%s208_s27] sm:$0x33 pattern:$0x76325410] %v314_v19 }
 0x10a PF: > { %s13_s14 = sadd.s32 1, %s488_s14   ;;  %s559_s12 = smov %s484_s13 }
 0x10b   : > { %p10_p5 = scmp.ge.s32.totalorder %s13_s14, 4   ;;  %s560_s13 = smov %s562_s15 }
 0x10d   :  { %12 = sbr.rel (!%p10_p5) target bundleno = 2 (0x2), region = 62 }

</bundles_post_ra>
